<compile_context>
chip_gen: v7x
topology: tpu7x:2x2x1
jax: 0.10.0
libtpu: 0.0.40
codegen_flags: <defaults>
</compile_context>

<pallas_src>
import functools

import jax
import jax.numpy as jnp
import numpy as np
from jax import lax
from jax.experimental import pallas as pl
from jax.experimental.pallas import tpu as pltpu


# ----------------------------------------------------------------------------
# Pallas kernel: fused MLP + GPR propagation + masked log-softmax
# ----------------------------------------------------------------------------
def gprgnn_kernel(x_ref, w1_ref, b1_ref, w2_ref, b2_ref, a_ref, temp_ref,
                  o_ref, z_scr, *, K, tm, C, N):
    """One grid step = (hop k, node-row tile i).

    k == 0      : MLP on row tile i -> z_0 tile; init hidden (= o_ref rows).
    1 <= k <= K : z_k[rows_i] = A[rows_i, :] @ z_{k-1};  hidden += temp[k]*z_k.
    k == K      : after accumulation, masked log-softmax over the C real lanes.

    z ping-pongs between the two N-row halves of z_scr (shape (2N, Cpad)) so
    the full z_{k-1} stays readable while z_k is written tile by tile.
    o_ref is the resident (N, Cpad) output block and doubles as the `hidden`
    accumulator; it is written back to HBM only once, at grid end.
    """
    k = pl.program_id(0)
    i = pl.program_id(1)
    row0 = pl.multiple_of(i * tm, tm)
    rows = pl.ds(row0, tm)

    @pl.when(k == 0)
    def _mlp():
        # TODO(synk): training-mode Dropout (args.dropout / args.dprate)
        # omitted; this is the deterministic eval-mode forward.
        h = jnp.dot(x_ref[...], w1_ref[...],
                    preferred_element_type=jnp.float32) + b1_ref[...]
        h = jnp.maximum(h, 0.0)
        z0 = jnp.dot(h, w2_ref[...],
                     preferred_element_type=jnp.float32) + b2_ref[...]
        z_scr[pl.ds(row0, tm), :] = z0                 # slot 0
        o_ref[rows, :] = temp_ref[0] * z0

    @pl.when(k > 0)
    def _hop():
        src = pl.multiple_of(((k - 1) % 2) * N, tm)
        dst = pl.multiple_of((k % 2) * N + row0, tm)
        z_prev = z_scr[pl.ds(src, N), :]               # full z_{k-1}, (N, Cpad)
        a = a_ref[...]                                 # (tm, N) adjacency rows
        z_new = jnp.dot(a, z_prev.astype(a.dtype),
                        preferred_element_type=jnp.float32)
        z_scr[pl.ds(dst, tm), :] = z_new
        o_ref[rows, :] = o_ref[rows, :] + temp_ref[k] * z_new

    @pl.when(k == K)
    def _log_softmax():
        hidden = o_ref[rows, :]
        lane = lax.broadcasted_iota(jnp.int32, hidden.shape, 1)
        hm = jnp.where(lane < C, hidden, -jnp.inf)     # mask padded class lanes
        m = jnp.max(hm, axis=1, keepdims=True)
        s = hm - m
        lse = jnp.log(jnp.sum(jnp.exp(s), axis=1, keepdims=True))
        o_ref[rows, :] = s - lse


def gprgnn_forward(x, w1, b1, w2, b2, a_norm, temp, *, row_tile=None):
    N, F = x.shape
    H = w1.shape[1]
    C = w2.shape[1]
    K = int(temp.shape[0]) - 1

    # Lane-pad the class dimension to a multiple of 128 (lane-dense tiles).
    Cp = ((max(C, 1) + 127) // 128) * 128
    w2p = jnp.zeros((H, Cp), w2.dtype).at[:, :C].set(w2)
    b2p = jnp.zeros((1, Cp), b2.dtype).at[:, :C].set(b2)

    # Node-row tile size (second-to-last dims must be multiples of 8).
    if row_tile is None:
        row_tile = 256 if N % 256 == 0 else (32 if N % 32 == 0 else N)
    tm = row_tile
    assert N % tm == 0 and (tm % 8 == 0 or tm == N)

    grid = (K + 1, N // tm)
    kernel = functools.partial(gprgnn_kernel, K=K, tm=tm, C=C, N=N)

    flops = 2 * N * F * H + 2 * N * H * Cp + 2 * K * N * N * Cp
    bytes_accessed = 4 * (N * F + F * H + H + H * Cp + Cp
                          + (K + 1) * N * N + N * Cp + (K + 1))
    cost = pl.CostEstimate(flops=flops, transcendentals=N * (Cp + 1),
                           bytes_accessed=bytes_accessed)

    out_padded = pl.pallas_call(
        kernel,
        out_shape=jax.ShapeDtypeStruct((N, Cp), jnp.float32),
        grid_spec=pltpu.PrefetchScalarGridSpec(
            num_scalar_prefetch=0,
            grid=grid,
            in_specs=[
                # TODO(synk): x / A tiles are also fetched during phases that
                # don't use them (x for k>0, A for k==0) -- harmless, ~1/(K+1)
                # extra DMA traffic.
                pl.BlockSpec((tm, F), lambda k, i: (i, 0)),      # x row tile
                pl.BlockSpec((F, H), lambda k, i: (0, 0)),       # w1
                pl.BlockSpec((1, H), lambda k, i: (0, 0)),       # b1
                pl.BlockSpec((H, Cp), lambda k, i: (0, 0)),      # w2 (padded)
                pl.BlockSpec((1, Cp), lambda k, i: (0, 0)),      # b2 (padded)
                pl.BlockSpec((tm, N), lambda k, i: (i, 0)),      # A row tile
                pl.BlockSpec(memory_space=pltpu.MemorySpace.SMEM),  # temp
            ],
            out_specs=pl.BlockSpec((N, Cp), lambda k, i: (0, 0)),
            scratch_shapes=[pltpu.VMEM((2 * N, Cp), jnp.float32)],  # z ping-pong
        ),
        compiler_params=pltpu.CompilerParams(
            # Row axis kept 'arbitrary': the resident output block and the z
            # ping-pong scratch are per-core, so megacore-sharding the row
            # axis would break the cross-hop dependence. k is a recurrence.
            dimension_semantics=("arbitrary", "arbitrary"),
            vmem_limit_bytes=64 * 1024 * 1024,
        ),
        cost_estimate=cost,
    )(x, w1, b1, w2p, b2p, a_norm, temp)

    return out_padded[:, :C]


# ----------------------------------------------------------------------------
# Glue: gcn_norm as a dense normalized adjacency (add self-loops, D^-1/2 A D^-1/2)
# ----------------------------------------------------------------------------
def gcn_norm_dense(edge_index, num_nodes, dtype=jnp.float32):
    # dtype=jnp.bfloat16 is a valid option on v6e/v7x (halves VMEM/HBM traffic
    # for A; MXU-only use); keep f32 here so the numerical check stays tight.
    src, dst = edge_index[0], edge_index[1]
    a = jnp.zeros((num_nodes, num_nodes), jnp.float32)
    # A[i, j] = 1 if there is an edge j -> i (message x_j aggregated at i)
    a = a.at[dst, src].set(1.0)
    a = a + jnp.eye(num_nodes, dtype=jnp.float32)          # add self-loops
    deg = jnp.sum(a, axis=1)                                # in-degree (+1)
    d_inv_sqrt = jnp.where(deg > 0, 1.0 / jnp.sqrt(deg), 0.0)
    return (d_inv_sqrt[:, None] * a * d_inv_sqrt[None, :]).astype(dtype)


# ----------------------------------------------------------------------------
# Pure-JAX reference (for correctness check)
# ----------------------------------------------------------------------------
def reference_forward(x, w1, b1, w2, b2, a_norm, temp):
    h = jnp.maximum(x @ w1 + b1, 0.0)
    z = h @ w2 + b2
    hidden = z * temp[0]
    for k in range(temp.shape[0] - 1):
        z = a_norm.astype(jnp.float32) @ z
        hidden = hidden + temp[k + 1] * z
    return jax.nn.log_softmax(hidden, axis=1)


# ----------------------------------------------------------------------------
# Main
# ----------------------------------------------------------------------------
if __name__ == "__main__":
    # Small synthetic problem consistent with GPRGNN:
    N = 64            # num nodes
    F = 32            # dataset.num_features
    H = 32            # args.hidden
    C = 8             # dataset.num_classes
    K = 10            # args.K
    alpha = 0.1       # args.alpha
    # args.Init = 'PPR' -> temp[k] = alpha*(1-alpha)**k, temp[-1] = (1-alpha)**K
    temp_np = alpha * (1.0 - alpha) ** np.arange(K + 1)
    temp_np[-1] = (1.0 - alpha) ** K
    temp = jnp.asarray(temp_np, dtype=jnp.float32)

    key = jax.random.PRNGKey(0)
    kx, kw1, kb1, kw2, kb2, ke = jax.random.split(key, 6)

    x = jax.random.normal(kx, (N, F), dtype=jnp.float32)

    # Deterministic Linear parameter init (Kaiming-uniform-like bounds)
    lim1 = 1.0 / np.sqrt(F)
    w1 = jax.random.uniform(kw1, (F, H), jnp.float32, -lim1, lim1)
    b1 = jax.random.uniform(kb1, (1, H), jnp.float32, -lim1, lim1)
    lim2 = 1.0 / np.sqrt(H)
    w2 = jax.random.uniform(kw2, (H, C), jnp.float32, -lim2, lim2)
    b2 = jax.random.uniform(kb2, (1, C), jnp.float32, -lim2, lim2)

    # Random undirected edge_index (2, E)
    E = 256
    src = jax.random.randint(ke, (E,), 0, N)
    dst = jax.random.randint(jax.random.fold_in(ke, 1), (E,), 0, N)
    edge_index = jnp.stack([jnp.concatenate([src, dst]),
                            jnp.concatenate([dst, src])], axis=0)

    a_norm = gcn_norm_dense(edge_index, N)

    out = gprgnn_forward(x, w1, b1, w2, b2, a_norm, temp)
    out = jax.block_until_ready(out)

    ref = reference_forward(x, w1, b1, w2, b2, a_norm, temp)
    np.testing.assert_allclose(np.asarray(out), np.asarray(ref),
                               rtol=1e-5, atol=1e-5)
    print("KERNEL_OK")
</pallas_src>

<mosaic_0001>
module attributes {stable_mosaic.version = 11 : i64} {
  func.func @gprgnn_kernel(%arg0: i32, %arg1: i32, %arg2: memref<32x32xf32, #tpu.memory_space<vmem>>, %arg3: memref<32x32xf32, #tpu.memory_space<vmem>>, %arg4: memref<1x32xf32, #tpu.memory_space<vmem>>, %arg5: memref<32x128xf32, #tpu.memory_space<vmem>>, %arg6: memref<1x128xf32, #tpu.memory_space<vmem>>, %arg7: memref<32x64xf32, #tpu.memory_space<vmem>>, %arg8: memref<11xf32, #tpu.memory_space<smem>>, %arg9: memref<64x128xf32, #tpu.memory_space<vmem>>, %arg10: memref<128x128xf32, #tpu.memory_space<vmem>>) attributes {dimension_semantics = [#tpu.dimension_semantics<arbitrary>, #tpu.dimension_semantics<arbitrary>], iteration_bounds = array<i64: 11, 2>, scalar_prefetch = 0 : i64, scratch_operands = 1 : i64, tpu.core_type = #tpu.core_type<tc>, window_params = [{transform_indices = @transform_0, window_bounds = array<i64: 32, 32>}, {pipeline_mode = #tpu.pipeline_mode<synchronous>, transform_indices = @transform_1, window_bounds = array<i64: 32, 32>}, {pipeline_mode = #tpu.pipeline_mode<synchronous>, transform_indices = @transform_2, window_bounds = array<i64: 1, 32>}, {pipeline_mode = #tpu.pipeline_mode<synchronous>, transform_indices = @transform_3, window_bounds = array<i64: 32, 128>}, {pipeline_mode = #tpu.pipeline_mode<synchronous>, transform_indices = @transform_4, window_bounds = array<i64: 1, 128>}, {transform_indices = @transform_5, window_bounds = array<i64: 32, 64>}, {transform_indices = @transform_6, window_bounds = array<i64: 11>}, {pipeline_mode = #tpu.pipeline_mode<synchronous>, transform_indices = @transform_7, window_bounds = array<i64: 64, 128>}]} {
    %c32_i32 = arith.constant 32 : i32
    %0 = arith.muli %arg1, %c32_i32 : i32
    %1 = tpu.assume_multiple %0, 32 : i32
    %c0_i32 = arith.constant 0 : i32
    %2 = arith.cmpi eq, %arg0, %c0_i32 : i32
    %3 = arith.extui %2 : i1 to i32
    %c0_i32_0 = arith.constant 0 : i32
    %4 = arith.cmpi ne, %3, %c0_i32_0 : i32
    scf.if %4 {
      %c0 = arith.constant 0 : index
      %c0_4 = arith.constant 0 : index
      %11 = vector.load %arg2[%c0, %c0_4] : memref<32x32xf32, #tpu.memory_space<vmem>>, vector<32x32xf32>
      %c0_5 = arith.constant 0 : index
      %c0_6 = arith.constant 0 : index
      %12 = vector.load %arg3[%c0_5, %c0_6] : memref<32x32xf32, #tpu.memory_space<vmem>>, vector<32x32xf32>
      %cst = arith.constant dense<0.000000e+00> : vector<32x32xf32>
      %13 = tpu.matmul %11, %12, %cst {dimension_numbers = #tpu.dot_dimension_numbers<[1], [0], [0], [1], [0, 0, 1, 1], [], []>} : vector<32x32xf32>, vector<32x32xf32>, vector<32x32xf32> -> vector<32x32xf32>
      %c0_7 = arith.constant 0 : index
      %c0_8 = arith.constant 0 : index
      %14 = vector.load %arg4[%c0_7, %c0_8] : memref<1x32xf32, #tpu.memory_space<vmem>>, vector<1x32xf32>
      %15 = vector.broadcast %14 : vector<1x32xf32> to vector<32x32xf32>
      %16 = arith.addf %13, %15 : vector<32x32xf32>
      %cst_9 = arith.constant 0.000000e+00 : f32
      %17 = vector.broadcast %cst_9 : f32 to vector<32x32xf32>
      %18 = arith.maximumf %16, %17 : vector<32x32xf32>
      %c0_10 = arith.constant 0 : index
      %c0_11 = arith.constant 0 : index
      %19 = vector.load %arg5[%c0_10, %c0_11] : memref<32x128xf32, #tpu.memory_space<vmem>>, vector<32x128xf32>
      %cst_12 = arith.constant dense<0.000000e+00> : vector<32x128xf32>
      %20 = tpu.matmul %18, %19, %cst_12 {dimension_numbers = #tpu.dot_dimension_numbers<[1], [0], [0], [1], [0, 0, 1, 1], [], []>} : vector<32x32xf32>, vector<32x128xf32>, vector<32x128xf32> -> vector<32x128xf32>
      %c0_13 = arith.constant 0 : index
      %c0_14 = arith.constant 0 : index
      %21 = vector.load %arg6[%c0_13, %c0_14] : memref<1x128xf32, #tpu.memory_space<vmem>>, vector<1x128xf32>
      %22 = vector.broadcast %21 : vector<1x128xf32> to vector<32x128xf32>
      %23 = arith.addf %20, %22 : vector<32x128xf32>
      %24 = arith.index_cast %1 : i32 to index
      %c0_15 = arith.constant 0 : index
      %25 = vector.load %arg10[%24, %c0_15] : memref<128x128xf32, #tpu.memory_space<vmem>>, vector<32x128xf32>
      tpu.vector_store %arg10[%24, %c0_15], %23 {strides = array<i32>} : memref<128x128xf32, #tpu.memory_space<vmem>>, vector<32x128xf32>,
      %c0_16 = arith.constant 0 : index
      %26 = memref.load %arg8[%c0_16] : memref<11xf32, #tpu.memory_space<smem>>
      %27 = vector.broadcast %26 : f32 to vector<32x128xf32>
      %28 = arith.mulf %27, %23 : vector<32x128xf32>
      %29 = arith.index_cast %1 : i32 to index
      %c0_17 = arith.constant 0 : index
      %30 = vector.load %arg9[%29, %c0_17] : memref<64x128xf32, #tpu.memory_space<vmem>>, vector<32x128xf32>
      tpu.vector_store %arg9[%29, %c0_17], %28 {strides = array<i32>} : memref<64x128xf32, #tpu.memory_space<vmem>>, vector<32x128xf32>,
    } else {
    }
    %c0_i32_1 = arith.constant 0 : i32
    %5 = arith.cmpi sgt, %arg0, %c0_i32_1 : i32
    %6 = arith.extui %5 : i1 to i32
    %c0_i32_2 = arith.constant 0 : i32
    %7 = arith.cmpi ne, %6, %c0_i32_2 : i32
    scf.if %7 {
      %c1_i32 = arith.constant 1 : i32
      %11 = arith.subi %arg0, %c1_i32 : i32
      %c2_i32 = arith.constant 2 : i32
      %c0_i32_4 = arith.constant 0 : i32
      %12 = arith.cmpi eq, %c2_i32, %c0_i32_4 : i32
      %c1_i32_5 = arith.constant 1 : i32
      %13 = arith.select %12, %c1_i32_5, %c2_i32 : i32
      %14 = arith.remsi %11, %13 : i32
      %c0_i32_6 = arith.constant 0 : i32
      %15 = arith.cmpi ne, %14, %c0_i32_6 : i32
      %c0_i32_7 = arith.constant 0 : i32
      %16 = arith.cmpi slt, %14, %c0_i32_7 : i32
      %c0_i32_8 = arith.constant 0 : i32
      %17 = arith.cmpi slt, %13, %c0_i32_8 : i32
      %18 = arith.xori %16, %17 : i1
      %19 = arith.andi %18, %15 : i1
      %20 = arith.addi %14, %13 : i32
      %21 = arith.select %19, %20, %14 : i32
      %c64_i32 = arith.constant 64 : i32
      %22 = arith.muli %21, %c64_i32 : i32
      %23 = tpu.assume_multiple %22, 32 : i32
      %c2_i32_9 = arith.constant 2 : i32
      %c0_i32_10 = arith.constant 0 : i32
      %24 = arith.cmpi eq, %c2_i32_9, %c0_i32_10 : i32
      %c1_i32_11 = arith.constant 1 : i32
      %25 = arith.select %24, %c1_i32_11, %c2_i32_9 : i32
      %26 = arith.remsi %arg0, %25 : i32
      %c0_i32_12 = arith.constant 0 : i32
      %27 = arith.cmpi ne, %26, %c0_i32_12 : i32
      %c0_i32_13 = arith.constant 0 : i32
      %28 = arith.cmpi slt, %26, %c0_i32_13 : i32
      %c0_i32_14 = arith.constant 0 : i32
      %29 = arith.cmpi slt, %25, %c0_i32_14 : i32
      %30 = arith.xori %28, %29 : i1
      %31 = arith.andi %30, %27 : i1
      %32 = arith.addi %26, %25 : i32
      %33 = arith.select %31, %32, %26 : i32
      %c64_i32_15 = arith.constant 64 : i32
      %34 = arith.muli %33, %c64_i32_15 : i32
      %35 = arith.addi %34, %1 : i32
      %36 = tpu.assume_multiple %35, 32 : i32
      %37 = arith.index_cast %23 : i32 to index
      %c0 = arith.constant 0 : index
      %38 = vector.load %arg10[%37, %c0] : memref<128x128xf32, #tpu.memory_space<vmem>>, vector<64x128xf32>
      %c0_16 = arith.constant 0 : index
      %c0_17 = arith.constant 0 : index
      %39 = vector.load %arg7[%c0_16, %c0_17] : memref<32x64xf32, #tpu.memory_space<vmem>>, vector<32x64xf32>
      %cst = arith.constant dense<0.000000e+00> : vector<32x128xf32>
      %40 = tpu.matmul %39, %38, %cst {dimension_numbers = #tpu.dot_dimension_numbers<[1], [0], [0], [1], [0, 0, 1, 1], [], []>} : vector<32x64xf32>, vector<64x128xf32>, vector<32x128xf32> -> vector<32x128xf32>
      %41 = arith.index_cast %36 : i32 to index
      %c0_18 = arith.constant 0 : index
      %42 = vector.load %arg10[%41, %c0_18] : memref<128x128xf32, #tpu.memory_space<vmem>>, vector<32x128xf32>
      tpu.vector_store %arg10[%41, %c0_18], %40 {strides = array<i32>} : memref<128x128xf32, #tpu.memory_space<vmem>>, vector<32x128xf32>,
      %43 = arith.index_cast %1 : i32 to index
      %c0_19 = arith.constant 0 : index
      %44 = vector.load %arg9[%43, %c0_19] : memref<64x128xf32, #tpu.memory_space<vmem>>, vector<32x128xf32>
      %45 = arith.index_cast %arg0 : i32 to index
      %46 = memref.load %arg8[%45] : memref<11xf32, #tpu.memory_space<smem>>
      %47 = vector.broadcast %46 : f32 to vector<32x128xf32>
      %48 = arith.mulf %47, %40 : vector<32x128xf32>
      %49 = arith.addf %44, %48 : vector<32x128xf32>
      %50 = arith.index_cast %1 : i32 to index
      %c0_20 = arith.constant 0 : index
      %51 = vector.load %arg9[%50, %c0_20] : memref<64x128xf32, #tpu.memory_space<vmem>>, vector<32x128xf32>
      tpu.vector_store %arg9[%50, %c0_20], %49 {strides = array<i32>} : memref<64x128xf32, #tpu.memory_space<vmem>>, vector<32x128xf32>,
    } else {
    }
    %c10_i32 = arith.constant 10 : i32
    %8 = arith.cmpi eq, %arg0, %c10_i32 : i32
    %9 = arith.extui %8 : i1 to i32
    %c0_i32_3 = arith.constant 0 : i32
    %10 = arith.cmpi ne, %9, %c0_i32_3 : i32
    scf.if %10 {
      %11 = arith.index_cast %1 : i32 to index
      %c0 = arith.constant 0 : index
      %12 = vector.load %arg9[%11, %c0] : memref<64x128xf32, #tpu.memory_space<vmem>>, vector<32x128xf32>
      %13 = tpu.iota {dimensions = array<i32: 1>} : vector<32x128xi32>
      %c8_i32 = arith.constant 8 : i32
      %14 = vector.broadcast %c8_i32 : i32 to vector<32x128xi32>
      %15 = arith.cmpi slt, %13, %14 : vector<32x128xi32>
      %cst = arith.constant 0xFF800000 : f32
      %16 = vector.broadcast %cst : f32 to vector<32x128xf32>
      %17 = arith.select %15, %12, %16 : vector<32x128xi1>, vector<32x128xf32>
      %cst_4 = arith.constant dense<0xFF800000> : vector<32xf32>
      %18 = vector.multi_reduction <maximumf>, %17, %cst_4 [1] : vector<32x128xf32> to vector<32xf32>
      %19 = vector.shape_cast %18 : vector<32xf32> to vector<32x1xf32>
      %20 = vector.broadcast %19 : vector<32x1xf32> to vector<32x128xf32>
      %21 = arith.subf %17, %20 : vector<32x128xf32>
      %22 = math.exp %21 : vector<32x128xf32>
      %cst_5 = arith.constant dense<0.000000e+00> : vector<32xf32>
      %23 = vector.multi_reduction <add>, %22, %cst_5 [1] : vector<32x128xf32> to vector<32xf32>
      %24 = vector.shape_cast %23 : vector<32xf32> to vector<32x1xf32>
      %25 = math.log %24 : vector<32x1xf32>
      %26 = vector.broadcast %25 : vector<32x1xf32> to vector<32x128xf32>
      %27 = arith.subf %21, %26 : vector<32x128xf32>
      %28 = arith.index_cast %1 : i32 to index
      %c0_6 = arith.constant 0 : index
      %29 = vector.load %arg9[%28, %c0_6] : memref<64x128xf32, #tpu.memory_space<vmem>>, vector<32x128xf32>
      tpu.vector_store %arg9[%28, %c0_6], %27 {strides = array<i32>} : memref<64x128xf32, #tpu.memory_space<vmem>>, vector<32x128xf32>,
    } else {
    }
    return
  }
  func.func @transform_0(%arg0: i32, %arg1: i32) -> (i32, i32) {
    %c0_i32 = arith.constant 0 : i32
    %c0_i32_0 = arith.constant 0 : i32
    return %arg1, %c0_i32 : i32, i32
  }
  func.func @transform_1(%arg0: i32, %arg1: i32) -> (i32, i32) {
    %c0_i32 = arith.constant 0 : i32
    %c0_i32_0 = arith.constant 0 : i32
    %c0_i32_1 = arith.constant 0 : i32
    return %c0_i32, %c0_i32_0 : i32, i32
  }
  func.func @transform_2(%arg0: i32, %arg1: i32) -> (i32, i32) {
    %c0_i32 = arith.constant 0 : i32
    %c0_i32_0 = arith.constant 0 : i32
    %c0_i32_1 = arith.constant 0 : i32
    return %c0_i32, %c0_i32_0 : i32, i32
  }
  func.func @transform_3(%arg0: i32, %arg1: i32) -> (i32, i32) {
    %c0_i32 = arith.constant 0 : i32
    %c0_i32_0 = arith.constant 0 : i32
    %c0_i32_1 = arith.constant 0 : i32
    return %c0_i32, %c0_i32_0 : i32, i32
  }
  func.func @transform_4(%arg0: i32, %arg1: i32) -> (i32, i32) {
    %c0_i32 = arith.constant 0 : i32
    %c0_i32_0 = arith.constant 0 : i32
    %c0_i32_1 = arith.constant 0 : i32
    return %c0_i32, %c0_i32_0 : i32, i32
  }
  func.func @transform_5(%arg0: i32, %arg1: i32) -> (i32, i32) {
    %c0_i32 = arith.constant 0 : i32
    %c0_i32_0 = arith.constant 0 : i32
    return %arg1, %c0_i32 : i32, i32
  }
  func.func @transform_6(%arg0: i32, %arg1: i32) -> i32 {
    %c0_i32 = arith.constant 0 : i32
    %c0_i32_0 = arith.constant 0 : i32
    return %c0_i32 : i32
  }
  func.func @transform_7(%arg0: i32, %arg1: i32) -> (i32, i32) {
    %c0_i32 = arith.constant 0 : i32
    %c0_i32_0 = arith.constant 0 : i32
    %c0_i32_1 = arith.constant 0 : i32
    return %c0_i32, %c0_i32_0 : i32, i32
  }
}

</mosaic_0001>

<bundles_post_ra>
// kernel: tpu_custom_call.1
= control target key start
LH: loop header
LB: loop body
LE: loop exit
PB: predicated region body
PF: predicated region fallthrough
CT: control target
= control target key end

     0   :  { %s2133_s0 = inlined_call_operand.hbm [shape: f32[64,32], index: 0, kind: input, shape index: {}]   ;;  %s2134_s1 = inlined_call_operand.hbm [shape: f32[32,32], index: 1, kind: input, shape index: {}]   ;;  %s2135_s2 = inlined_call_operand.hbm [shape: f32[1,32], index: 2, kind: input, shape index: {}]   ;;  %s2136_s3 = inlined_call_operand.hbm [shape: f32[32,128], index: 3, kind: input, shape index: {}]   ;;  %s2137_s4 = inlined_call_operand.hbm [shape: f32[1,128], index: 4, kind: input, shape index: {}]   ;;  %s2138_s5 = inlined_call_operand.hbm [shape: f32[64,64], index: 5, kind: input, shape index: {}]   ;;  %s2139_s6 = inlined_call_operand.hbm [shape: f32[11], index: 6, kind: input, shape index: {}]   ;;  %s2140_s7 = inlined_call_operand.hbm [shape: f32[64,128], index: 7, kind: output, shape index: {}]  }
   0x1   :  { %2149 = sst [smem:[#allocation25_spill]] %s2133_s0 }
   0x2   :  { %2150 = sst [smem:[#allocation26_spill]] %s2134_s1 }
   0x3   :  { %2151 = sst [smem:[#allocation27_spill]] %s2135_s2 }
   0x4   :  { %2152 = sst [smem:[#allocation28_spill]] %s2140_s7 }
   0x5   :  { %12 = vsyncpa [#allocation4], 0 }
   0x6   :  { %14 = vsyncpa [#allocation4 + $0x1], 0 }
   0x7   :  { %15 = vsyncpa [#allocation8], 0 }
   0x8   :  { %16 = vsyncpa [#allocation11], 0 }
   0x9   :  { %17 = vsyncpa [#allocation14], 0 }
   0xa   :  { %19 = vsyncpa [#allocation14 + $0x1], 0 }
   0xb   :  { %20 = vsyncpa [#allocation6], 0 }
   0xc   :  { %21 = vsyncpa [#allocation5], 0  ;;  %s1714_s24 = smov 0   ;;  %s1716_s25 = smov 0  }
   0xd   :  { %s1718_s26 = smov 0   ;;  %s1720_s27 = smov 0  }
   0xe   :  { %s1722_s28 = smov 0   ;;  %s1724_s29 = smov 0  }
   0xf   :  { %s1726_s30 = smov 0   ;;  %s1728_s8 = smov 0  }
  0x10 LB: > { %2153 = sst [smem:[#allocation23_spill]] %s1644_s27  ;;  %s2141_s9 = sadd.s32 4294967295, %s1660_s8   ;;  %s1660_s8 = sphi %s1728_s8, %s27_s8   ;;  %s1656_s30 = sphi %s1726_s30, %s2185_s30   ;;  %s1652_s29 = sphi %s1724_s29, %s2184_s29   ;;  %s1648_s28 = sphi %s1722_s28, %s2183_s28   ;;  %s1644_s27 = sphi %s1720_s27, %s2182_s27   ;;  %s1640_s26 = sphi %s1718_s26, %s2181_s26   ;;  %s1636_s25 = sphi %s1716_s25, %s2180_s25   ;;  %s1632_s24 = sphi %s1714_s24, %s2179_s24  }
  0x11   : > { %2154 = sst [smem:[#allocation24_spill]] %s1648_s28  ;;  %p1037_p0 = scmp.ge.s32.totalorder %s1660_s8, 1 }
  0x12   : > { %p1758_p1 = scmp.eq.s32.totalorder %s2141_s9, 0  ;;  %p222_p2 = scmp.lt.s32.totalorder %s1660_s8, 23 }
  0x13   : > { %s1662_s12 = smov [#allocation7]   ;;  %s1663_s15 = smov [#allocation10]  }
  0x14   : > { %s2155_s10 = scalar_select %p1758_p1, 1, 0 }
  0x15   : > { %p1763_p3 = pnand %p1037_p0, %p222_p2  ;;  %s234_s13 = sshll.u32 %s1662_s12, 4  ;;  %s1767_s13 = int_to_ptr.vmem [resolvable:$true] %s234_s13 }
  0x16   : > { %s258_s16 = sshll.u32 %s1663_s15, 4  ;;  %s1664_s17 = smov [#allocation9]   ;;  %s1777_s16 = int_to_ptr.vmem [resolvable:$true] %s258_s16 }
  0x17   : > { %s2156_s11 = scalar_select %p1763_p3, 1, 0 }
  0x18   : > { %p1237_p4 = pneg %p1763_p3  ;;  %s1779_s18 = sshll.u32 %s1664_s17, 4  ;;  %s249_s18 = int_to_ptr.vmem [resolvable:$true] %s1779_s18 }
  0x19   : > { %s2158_s1 = sld [smem:[#allocation26_spill]] }
  0x1a   : > { %p1773_p5 = pnand %p1237_p4, %p1758_p1 }
  0x1c   : > { %p1789_p7 = pneg %p1773_p5 }
  0x1f   : > { %s1363_s21 = scalar_lea.hbm %s2158_s1, 512 }
  0x20   : > { %p1364_p6 = scmp.ne.s32.totalorder %s2158_s1, %s1363_s21  ;;  %p1370_p10 = scmp.lt.u32.totalorder %s1363_s21, %s2158_s1 }
  0x22   : > { %p1366_p8 = pnand %p1789_p7, %p1364_p6 }
  0x24   : > { %p1367_p9 = pneg %p1366_p8 }
  0x26   : > { %p1372_p11 = pnand %p1370_p10, %p1367_p9 }
  0x28   : > { %1375 = shalt.err (!%p1372_p11)
}
  0x29   : > { %s1376_s19 = scalar_lea.vmem %s1767_s13, 512  ;;  %p1384_p2 = scmp.lt.s32.totalorder %s1767_s13, %s1767_s13 }
  0x2a   : > { %p1377_p12 = scmp.ne.s32.totalorder %s1767_s13, %s1376_s19  ;;  %p1385_p4 = scmp.lt.s32.totalorder %s1376_s19, %s1376_s19 }
  0x2c   : > { %p1379_p13 = pnand %p1377_p12, %p1789_p7  ;;  %p1386_p6 = por %p1385_p4, %p1384_p2 }
  0x2e   : > { %p1380_p0 = pneg %p1379_p13 }
  0x30   : > { %p1387_p8 = pnand %p1386_p6, %p1380_p0 }
  0x32   : > { %1390 = shalt.err (!%p1387_p8)
}
  0x33   : > { %s1665_s20 = smov 128   ;;  %s1666_s21 = smov 8  }
  0x34   : > { %1240 = dma.hbm_to_vmem [thread:$0]  (!%p1773_p5), %s2158_s1, 512, %s1767_s13, [#allocation8], %s1665_s20, %s1665_s20, %s1666_s21  }
  0x35   : > { %s1391_s19 = scalar_lea.hbm %s2136_s3, 512 }
  0x36   : > { %p1392_p9 = scmp.ne.s32.totalorder %s2136_s3, %s1391_s19  ;;  %p1398_p12 = scmp.lt.u32.totalorder %s1391_s19, %s2136_s3 }
  0x38   : > { %p1394_p10 = pnand %p1392_p9, %p1789_p7 }
  0x3a   : > { %p1395_p11 = pneg %p1394_p10 }
  0x3c   : > { %p1400_p13 = pnand %p1398_p12, %p1395_p11 }
  0x3e   : > { %1403 = shalt.err (!%p1400_p13)
}
  0x3f   : > { %s1404_s13 = scalar_lea.vmem %s1777_s16, 512  ;;  %p1412_p6 = scmp.lt.s32.totalorder %s1777_s16, %s1777_s16 }
  0x40   : > { %p1405_p0 = scmp.ne.s32.totalorder %s1777_s16, %s1404_s13  ;;  %p1413_p8 = scmp.lt.s32.totalorder %s1404_s13, %s1404_s13 }
  0x42   : > { %p1407_p2 = pnand %p1405_p0, %p1789_p7  ;;  %p1414_p9 = por %p1413_p8, %p1412_p6 }
  0x44   : > { %p1408_p4 = pneg %p1407_p2 }
  0x46   : > { %p1415_p10 = pnand %p1414_p9, %p1408_p4 }
  0x48   : > { %1418 = shalt.err (!%p1415_p10)
}
  0x49   : > { %1246 = dma.hbm_to_vmem [thread:$0]  (!%p1773_p5), %s2136_s3, 512, %s1777_s16, [#allocation11], %s1665_s20, %s1665_s20, %s1666_s21  }
  0x4a   : > { %s2160_s2 = sld [smem:[#allocation27_spill]] }
  0x50   : > { %s1419_s22 = scalar_lea.hbm %s2160_s2, 16 }
  0x51   : > { %p1420_p11 = scmp.ne.s32.totalorder %s2160_s2, %s1419_s22  ;;  %p1426_p0 = scmp.lt.u32.totalorder %s1419_s22, %s2160_s2 }
  0x53   : > { %p1422_p12 = pnand %p1420_p11, %p1789_p7 }
  0x55   : > { %p1423_p13 = pneg %p1422_p12 }
  0x57   : > { %p1428_p2 = pnand %p1426_p0, %p1423_p13 }
  0x59   : > { %1431 = shalt.err (!%p1428_p2)
}
  0x5a   : > { %s1432_s13 = scalar_lea.vmem %s249_s18, 16  ;;  %s1439_s16 = scalar_lea.vmem %s249_s18, 32 }
  0x5b   : > { %p1433_p4 = scmp.ne.s32.totalorder %s249_s18, %s1432_s13  ;;  %p1440_p9 = scmp.lt.s32.totalorder %s249_s18, %s249_s18 }
  0x5c   : > { %p1441_p10 = scmp.lt.s32.totalorder %s1439_s16, %s1432_s13 }
  0x5d   : > { %p1435_p6 = pnand %p1433_p4, %p1789_p7 }
  0x5e   : > { %p1442_p3 = por %p1441_p10, %p1440_p9 }
  0x5f   : > { %p1436_p8 = pneg %p1435_p6 }
  0x61   : > { %p1443_p1 = pnand %p1442_p3, %p1436_p8 }
  0x63   : > { %1446 = shalt.err (!%p1443_p1)
}
  0x64   : > { %1243 = dma.hbm_to_vmem [thread:$0]  (!%p1773_p5), %s2160_s2, 16, %s249_s18, [#allocation8]  }
  0x65   : > { %s1667_s28 = smov [#allocation12]   ;;  %s1447_s15 = scalar_lea.hbm %s2137_s4, 16 }
  0x66   : > { %s272_s9 = sshll.u32 %s1667_s28, 4  ;;  %p1448_p11 = scmp.ne.s32.totalorder %s2137_s4, %s1447_s15  ;;  %s273_s9 = int_to_ptr.vmem [resolvable:$true] %s272_s9 }
  0x67   : > { %p1454_p12 = scmp.lt.u32.totalorder %s1447_s15, %s2137_s4 }
  0x68   : > { %p1450_p1 = pnand %p1448_p11, %p1789_p7 }
  0x6a   : > { %p1451_p3 = pneg %p1450_p1 }
  0x6c   : > { %p1456_p13 = pnand %p1454_p12, %p1451_p3 }
  0x6e   : > { %1459 = shalt.err (!%p1456_p13)
}
  0x6f   : > { %s1460_s18 = scalar_lea.vmem %s273_s9, 16  ;;  %s1467_s7 = scalar_lea.vmem %s273_s9, 32 }
  0x70   : > { %p1461_p0 = scmp.ne.s32.totalorder %s273_s9, %s1460_s18  ;;  %p1468_p6 = scmp.lt.s32.totalorder %s273_s9, %s273_s9 }
  0x71   : > { %p1469_p8 = scmp.lt.s32.totalorder %s1467_s7, %s1460_s18 }
  0x72   : > { %p1463_p2 = pnand %p1461_p0, %p1789_p7 }
  0x73   : > { %p1470_p9 = por %p1469_p8, %p1468_p6 }
  0x74   : > { %p1464_p4 = pneg %p1463_p2 }
  0x76   : > { %p1471_p10 = pnand %p1470_p9, %p1464_p4 }
  0x78   : > { %1474 = shalt.err (!%p1471_p10)
}
  0x79   : > { %1249 = dma.hbm_to_vmem [thread:$0]  (!%p1773_p5), %s2137_s4, 16, %s273_s9, [#allocation11]  }
  0x7a   : > { %s1475_s15 = scalar_lea.hbm %s2139_s6, 16 }
  0x7b   : > { %p1476_p11 = scmp.ne.s32.totalorder %s2139_s6, %s1475_s15  ;;  %p1482_p12 = scmp.lt.u32.totalorder %s1475_s15, %s2139_s6 }
  0x7d   : > { %p1478_p1 = pnand %p1476_p11, %p1789_p7 }
  0x7f   : > { %p1479_p3 = pneg %p1478_p1 }
  0x81   : > { %p1484_p13 = pnand %p1482_p12, %p1479_p3 }
  0x83   : > { %1487 = shalt.err (!%p1484_p13)
}
  0x84   : > { %s1668_s18 = smov [#allocation15]   ;;  %s36_s12 = sadd.s32 1, %s1652_s29 }
  0x85   : > { %1252 = dma.hbm_to_smem (!%p1773_p5), %s2139_s6, 16, %s1668_s18, [#allocation6]  }
  0x86   : > { %p37_p7 = scmp.ge.s32.totalorder %s36_s12, 2  ;;  %s39_s14 = sadd.s32 1, %s1656_s30 }
  0x87   : > { %s46_s27 = sadd.s32 1, %s1640_s26  ;;  %p53_p0 = scmp.ne.s32.totalorder %s1640_s26, %s1636_s25 }
  0x88   : > { %s2187_s12 = smov (%p37_p7, %s36_s12), 0  ;;  %s2189_s14 = smov (!%p37_p7, %s39_s14), %s1656_s30 }
  0x89   : > { %s43_s28 = ssub.s32 %s1652_s29, %s2187_s12  ;;  %p54_p2 = scmp.eq.s32.totalorder %s1660_s8, 0 }
  0x8a   : > { %p41_p4 = scmp.ge.s32.totalorder %s2189_s14, 11  ;;  %p44_p6 = scmp.eq.s32.totalorder %s43_s28, 0 }
  0x8b   : > { %p55_p8 = por %p54_p2, %p53_p0  ;;  %p59_p5 = scmp.ne.s32.totalorder %s1636_s25, %s1632_s24 }
  0x8c   : > { %s2191_s14 = smov (%p41_p4, %s2189_s14), 0  ;;  %p2161_p9 = scmp.ne.s32.totalorder %s2155_s10, 0 }
  0x8d   : > { %s1908_s22 = scalar_select %p44_p6, %s1640_s26, %s46_s27  }
  0x8e   : > { %p1912_p10 = por %p2161_p9, %p59_p5  ;;  %p1265_p11 = scmp.lt.s32.totalorder %s1660_s8, 22 }
  0x8f   : > { %s1918_s15 = sand.u32 1, %s1640_s26   ;;  %s2148_s17 = sshll.u32 %s1652_s29, 9 }
  0x90   : > { %s2147_s19 = sshll.u32 %s1918_s15, 5  ;;  %s2163_s0 = sld [smem:[#allocation25_spill]] }
  0x91   : > { %s296_s18 = scalar_lea.vmem [#allocation3], %s2147_s19  ;;  %p1931_p1 = pnand %p1265_p11, %p55_p8 }
  0x92   : > { %s303_s9 = sshll.u32 %s296_s18, 4  ;;  %s1935_s9 = int_to_ptr.vmem [resolvable:$true] %s303_s9 }
  0x93   : > { %p1490_p12 = pneg %p1931_p1 }
  0x96   : > { %s1927_s16 = scalar_lea.hbm %s2163_s0, %s2148_s17  ;;  %s1493_s18 = scalar_lea.hbm %s2163_s0, 1024 }
  0x97   : > { %s1488_s28 = scalar_lea.hbm %s1927_s16, 512  ;;  %p1494_p0 = scmp.lt.u32.totalorder %s1927_s16, %s2163_s0 }
  0x98   : > { %p1489_p3 = scmp.ne.s32.totalorder %s1927_s16, %s1488_s28  ;;  %p1495_p2 = scmp.lt.u32.totalorder %s1493_s18, %s1488_s28 }
  0x99   : > { %p1497_p6 = scmp.lt.u32.totalorder %s1488_s28, %s1927_s16 }
  0x9a   : > { %p1491_p13 = pnand %p1490_p12, %p1489_p3  ;;  %p1496_p4 = por %p1495_p2, %p1494_p0 }
  0x9c   : > { %p1492_p7 = pneg %p1491_p13  ;;  %p1498_p8 = por %p1497_p6, %p1496_p4 }
  0x9e   : > { %p1499_p5 = pnand %p1498_p8, %p1492_p7 }
  0xa0   : > { %1502 = shalt.err (!%p1499_p5)
}
  0xa1   : > { %s1503_s27 = scalar_lea.vmem %s1935_s9, 512  ;;  %s1669_s13 = smov [#allocation3]  }
  0xa2   : > { %p1504_p9 = scmp.ne.s32.totalorder %s1935_s9, %s1503_s27  ;;  %s1508_s24 = sshll.u32 %s1669_s13, 4  ;;  %s1509_s24 = int_to_ptr.vmem [resolvable:$false] %s1508_s24 }
  0xa3   : > { %s1510_s17 = scalar_lea.vmem %s1509_s24, 1024  ;;  %p1511_p13 = scmp.lt.s32.totalorder %s1935_s9, %s1509_s24 }
  0xa4   : > { %p1506_p11 = pnand %p1504_p9, %p1490_p12  ;;  %p1512_p0 = scmp.lt.s32.totalorder %s1510_s17, %s1503_s27 }
  0xa6   : > { %p1507_p3 = pneg %p1506_p11  ;;  %p1513_p2 = por %p1512_p0, %p1511_p13 }
  0xa8   : > { %p1514_p4 = pnand %p1513_p2, %p1507_p3 }
  0xaa   : > { %1517 = shalt.err (!%p1514_p4)
}
  0xab   : > { %s2165_s19 = scalar_lea.sflag [#allocation4], %s1918_s15  ;;  %s2166_s28 = sshll.u32 %s1652_s29, 9 }
  0xac   : > { %1256 = dma.hbm_to_vmem [thread:$0]  (!%p1931_p1), %s1927_s16, 512, %s1935_s9, %s2165_s19, %s1665_s20, %s1665_s20, %s1666_s21  }
  0xad   : > { %s1973_s13 = scalar_lea.hbm %s2138_s5, %s2166_s28  ;;  %s2167_s24 = sshll.u32 %s1918_s15, 5 }
  0xae   : > { %s317_s17 = scalar_lea.vmem [#allocation13], %s2167_s24  ;;  %s314_s1 = scalar_lea.sflag [#allocation14], %s1918_s15 }
  0xaf   : > { %s324_s0 = sshll.u32 %s317_s17, 4  ;;  %s1518_s2 = scalar_lea.hbm %s1973_s13, 512  ;;  %s1977_s0 = int_to_ptr.vmem [resolvable:$true] %s324_s0 }
  0xb0   : > { %p1519_p7 = scmp.ne.s32.totalorder %s1973_s13, %s1518_s2  ;;  %s1523_s19 = scalar_lea.hbm %s2138_s5, 1024 }
  0xb1   : > { %p1524_p5 = scmp.lt.u32.totalorder %s1973_s13, %s2138_s5  ;;  %p1525_p9 = scmp.lt.u32.totalorder %s1523_s19, %s1518_s2 }
  0xb2   : > { %p1521_p6 = pnand %p1519_p7, %p1490_p12  ;;  %p1527_p3 = scmp.lt.u32.totalorder %s1518_s2, %s1973_s13 }
  0xb3   : > { %p1526_p11 = por %p1525_p9, %p1524_p5 }
  0xb4   : > { %p1522_p8 = pneg %p1521_p6 }
  0xb5   : > { %p1528_p13 = por %p1527_p3, %p1526_p11 }
  0xb7   : > { %p1529_p0 = pnand %p1528_p13, %p1522_p8 }
  0xb9   : > { %1532 = shalt.err (!%p1529_p0)
}
  0xba   : > { %s1533_s27 = scalar_lea.vmem %s1977_s0, 512  ;;  %s1670_s24 = smov [#allocation13]  }
  0xbb   : > { %p1534_p2 = scmp.ne.s32.totalorder %s1977_s0, %s1533_s27  ;;  %s1538_s17 = sshll.u32 %s1670_s24, 4  ;;  %s1539_s17 = int_to_ptr.vmem [resolvable:$false] %s1538_s17 }
  0xbc   : > { %s1540_s16 = scalar_lea.vmem %s1539_s17, 1024  ;;  %p1541_p6 = scmp.lt.s32.totalorder %s1977_s0, %s1539_s17 }
  0xbd   : > { %p1536_p4 = pnand %p1534_p2, %p1490_p12  ;;  %p1542_p5 = scmp.lt.s32.totalorder %s1540_s16, %s1533_s27 }
  0xbf   : > { %p1537_p7 = pneg %p1536_p4  ;;  %p1543_p9 = por %p1542_p5, %p1541_p6 }
  0xc1   : > { %p1544_p11 = pnand %p1543_p9, %p1537_p7 }
  0xc3   : > { %1547 = shalt.err (!%p1544_p11)
}
  0xc4   : > { %1259 = dma.hbm_to_vmem [thread:$0]  (!%p1931_p1), %s1973_s13, 512, %s1977_s0, %s314_s1, %s1665_s20, %s1665_s20, %s1666_s21  }
  0xc5   : > { %p2168_p12 = scmp.ne.s32.totalorder %s2156_s11, 0 }
  0xc6   : > { %s338_s2 = sand.u32 (!%p2168_p12), 1, %s1636_s25  }
  0xc7   : > { %336 = sbr.rel (%p2168_p12) target bundleno = 1305 (0x519), region = 48  ;;  %s1051_s9 = sshll.u32 (!%p2168_p12), %s338_s2, 5 }
  0xc8   : > { %s339_s19 = scalar_lea.sflag (!%p2168_p12), [#allocation4], %s338_s2  ;;  %s2011_s28 = scalar_lea.vmem (!%p2168_p12), [#allocation3], %s1051_s9 }
  0xce   : > { %1607 = dma.done.wait (%p1912_p10), %s339_s19, 512  }
  0xcf   : > { %1609 = vsyncadd (%p1912_p10), %s339_s19, 4294966784  ;;  %p2169_p8 = scmp.ne.s32.totalorder %s2155_s10, 0 }
  0xd1   : > { %1611 = dma.done.wait (%p2169_p8), [#allocation8], 528  }
  0xd2   : > { %1613 = vsyncadd (%p2169_p8), [#allocation8], 4294966768 }
  0xd3   : > { %1615 = dma.done.wait (%p2169_p8), [#allocation11], 528  }
  0xd4   : > { %1617 = vsyncadd (%p2169_p8), [#allocation11], 4294966768  ;;  %s364_s0 = scalar_lea.sflag [#allocation14], %s338_s2  ;;  %s2025_s1 = scalar_lea.vmem [#allocation13], %s1051_s9 }
  0xd5   : > { %1619 = dma.done.wait (%p1912_p10), %s364_s0, 512  }
  0xd6   : > { %1621 = vsyncadd (%p1912_p10), %s364_s0, 4294966784 }
  0xd7   : > { %1623 = dma.done.wait (%p2169_p8), [#allocation6], 16  }
  0xd8   : > { %1625 = vsyncadd (%p2169_p8), [#allocation6], 4294967280 }
  0xd9   : > { %376 = sfence }
  0xda   : > { %s2170_s11 = sld [smem:[#allocation23_spill]]  ;;  %s2171_s21 = sld [smem:[#allocation24_spill]] }
  0xe0   : > { %s2036_s20 = sshll.u32 %s2170_s11, 5  ;;  %p1059_p1 = scmp.ne.s32.totalorder %s2171_s21, 0 }
  0xe1   : > { %v414_v0 = vld [vmem:[#allocation7] sm:$0xff] (!%p1059_p1)  ;;  %v415_v1 = vld [vmem:[#allocation7 + $0x8] sm:$0xff] (!%p1059_p1)  ;;  %v416_v2 = vld [vmem:[#allocation7 + $0x10] sm:$0xff] (!%p1059_p1)  ;;  %vm425_vm0 = vcmask (!%p1059_p1), 261120   ;;  %s640_s10 = sld [smem:[#allocation15]] (!%p1059_p1)  ;;  %s635_s23 = scalar_lea.vmem (!%p1059_p1), [#allocation2], %s2036_s20 }
  0xe2   : > { %409 = sbr.rel (%p1059_p1) target bundleno = 676 (0x2a4), region = 80  ;;  %v1169_v3 = vpack.c.bf16 (!%p1059_p1), %v415_v1, %v414_v0  ;;  %v417_v4 = vld [vmem:[#allocation7 + $0x18] sm:$0xff] (!%p1059_p1)  ;;  %v410_v5 = vld [vmem:[%s2011_s28] sm:$0xff] (!%p1059_p1)  ;;  %v528_v8 = vld [vmem:[#allocation10 + $0x8] sm:$0xff] (!%p1059_p1)  ;;  %s646_s15 = scalar_lea.vmem (!%p1059_p1), [#allocation16], %s2036_s20 }
  0xe3   : > { %v1173_v6 = vpack.c.bf16 (!%p1059_p1), %v417_v4, %v416_v2  ;;  %1127 = vmatprep.mubr.msk.f32.mxu0 (!%p1059_p1), %vm425_vm0, %v410_v5  ;;  %v527_v7 = vld [vmem:[#allocation10] sm:$0xff] (!%p1059_p1)  ;;  %v412_v11 = vld [vmem:[%s2011_s28 + $0x10] sm:$0xff] (!%p1059_p1)  ;;  %v413_v12 = vld [vmem:[%s2011_s28 + $0x18] sm:$0xff] (!%p1059_p1) }
  0xe4   : > { %1170 = vmatprep.subr.bf16.mxu0 (!%p1059_p1), %v1169_v3  ;;  %v1177_v9 = vpack.c.bf16 (!%p1059_p1), %v528_v8, %v527_v7  ;;  %v411_v10 = vld [vmem:[%s2011_s28 + $0x8] sm:$0xff] (!%p1059_p1)  ;;  %v529_v13 = vld [vmem:[#allocation10 + $0x10] sm:$0xff] (!%p1059_p1)  ;;  %v530_v14 = vld [vmem:[#allocation10 + $0x18] sm:$0xff] (!%p1059_p1) }
  0xe5   : > { %1172 = vmatpush3.bf16.msra.mxu0 (!%p1059_p1), %v1169_v3  ;;  %v1181_v15 = vpack.c.bf16 (!%p1059_p1), %v530_v14, %v529_v13  ;;  %v1060_v16 = vld [vmem:[#allocation9] ss:$0 sm:$0xff] (!%p1059_p1)  ;;  %v1065_v29 = vld [vmem:[#allocation12] ss:$0 sm:$0xff] (!%p1059_p1) }
  0xe6   : > { %1174 = vmatprep.subr.bf16.mxu0 (!%p1059_p1), %v1173_v6  ;;  %1178 = vmatprep.subr.bf16.mxu1 (!%p1059_p1), %v1177_v9 }
  0xe7   : > { %1180 = vmatpush3.bf16.msra.mxu1 (!%p1059_p1), %v1177_v9  ;;  %v641_v31 = vstv (!%p1059_p1), %s640_s10 }
  0xe8   : > { %1182 = vmatprep.subr.bf16.mxu1 (!%p1059_p1), %v1181_v15 }
  0xe9   : > { %1176 = vmatpush3.bf16.msra.mxu0 %v1173_v6 }
  0xeb   : > { %1184 = vmatpush3.bf16.msra.mxu1 %v1181_v15 }
  0xec   : > { %1128 = vmatmul.mubr.msk.f32.vlgmr.msra.gmra.mrb[0].mxu0 %vm425_vm0, %v411_v10 }
  0xed   : > { %1130 = vmatprep.mubr.msk.f32.mxu0 %vm425_vm0, %v412_v11 }
  0xf0   : > { %1131 = vmatmul.mubr.msk.f32.gmra.mrb[2].mxu0 %vm425_vm0, %v413_v12 }
 0x1bf   : > { %v1129_v17 = vpop.f32.mrb[0].mxu0 }
 0x1c0   : > { %v510_v18 = vadd.f32 %v1129_v17, %v1060_v16  ;;  %v504_v19 = vpop.f32.mrb[1].mxu0 }
 0x1c1   : > { %v505_v20 = vadd.f32 %v1060_v16, %v504_v19 }
 0x1c2   : > { %v524_v23 = vmax.f32 %v510_v18, 0.0 }
 0x1c3   : > { %v523_v21 = vmax.f32 %v505_v20, 0.0  ;;  %v1132_v22 = vpop.f32.mrb[2].mxu0 }
 0x1c4   : > { %v520_v24 = vadd.f32 %v1132_v22, %v1060_v16  ;;  %v514_v25 = vpop.f32.mrb[3].mxu0 }
 0x1c5   : > { %v515_v26 = vadd.f32 %v1060_v16, %v514_v25  ;;  %1141 = vmatprep.mubr.msk.f32.mxu1 %vm425_vm0, %v523_v21 }
 0x1c6   : > { %1142 = vmatmul.mubr.msk.f32.vlgmr.msra.gmra.mrb[0].mxu1 %vm425_vm0, %v524_v23  ;;  %v526_v28 = vmax.f32 %v520_v24, 0.0 }
 0x1c7   : > { %v525_v27 = vmax.f32 %v515_v26, 0.0 }
 0x1c9   : > { %1144 = vmatprep.mubr.msk.f32.mxu1 %vm425_vm0, %v525_v27 }
 0x1ca   : > { %1145 = vmatmul.mubr.msk.f32.gmra.mrb[2].mxu1 %vm425_vm0, %v526_v28 }
 0x299   : > { %v1143_v30 = vpop.f32.mrb[0].mxu1 }
 0x29a   : > { %v622_v32 = vadd.f32 %v1143_v30, %v1065_v29  ;;  %v616_v33 = vpop.f32.mrb[1].mxu1 }
 0x29b   : > { %v617_v34 = vadd.f32 %v1065_v29, %v616_v33 }
 0x29c   : > { %637 = vst [vmem:[%s635_s23 + $0x8] sm:$0xff] %v622_v32  ;;  %v643_v35 = vmul.f32 %v641_v31, %v622_v32 }
 0x29d   : > { %636 = vst [vmem:[%s635_s23] sm:$0xff] %v617_v34  ;;  %v642_v36 = vmul.f32 %v641_v31, %v617_v34  ;;  %v1146_v37 = vpop.f32.mrb[2].mxu1 }
 0x29e   : > { %648 = vst [vmem:[%s646_s15 + $0x8] sm:$0xff] %v643_v35  ;;  %v632_v38 = vadd.f32 %v1146_v37, %v1065_v29  ;;  %v626_v39 = vpop.f32.mrb[3].mxu1 }
 0x29f   : > { %647 = vst [vmem:[%s646_s15] sm:$0xff] %v642_v36  ;;  %v627_v40 = vadd.f32 %v1065_v29, %v626_v39 }
 0x2a0   : > { %639 = vst [vmem:[%s635_s23 + $0x18] sm:$0xff] %v632_v38  ;;  %v645_v41 = vmul.f32 %v641_v31, %v632_v38 }
 0x2a1   : > { %638 = vst [vmem:[%s635_s23 + $0x10] sm:$0xff] %v627_v40  ;;  %v644_v42 = vmul.f32 %v641_v31, %v627_v40 }
 0x2a2   : > { %650 = vst [vmem:[%s646_s15 + $0x18] sm:$0xff] %v645_v41 }
 0x2a3   : > { %649 = vst [vmem:[%s646_s15 + $0x10] sm:$0xff] %v644_v42 }
 0x2a4 PF: > { %s2172_s7 = sld [smem:[#allocation24_spill]] }
 0x2aa   : > { %p1070_p10 = scmp.le.s32.totalorder %s2172_s7, 0 }
 0x2ab   : > { %s2173_s13 = sld [smem:[#allocation24_spill]] (!%p1070_p10)  ;;  %v692_v43 = vld [vmem:[%s2025_s1] sm:$0xff] (!%p1070_p10)  ;;  %vm696_vm1 = vcmask (!%p1070_p10), 523264   ;;  %v694_v44 = vld [vmem:[%s2025_s1 + $0x10] sm:$0xff] (!%p1070_p10)  ;;  %v693_v57 = vld [vmem:[%s2025_s1 + $0x8] sm:$0xff] (!%p1070_p10) }
 0x2ac   : > { %654 = sbr.rel (%p1070_p10) target bundleno = 937 (0x3a9), region = 84  ;;  %1163 = vmatprep.mubr.msk.f32.mxu0 (!%p1070_p10), %vm696_vm1, %v692_v43  ;;  %1166 = vmatprep.mubr.msk.f32.mxu1 (!%p1070_p10), %vm696_vm1, %v694_v44  ;;  %v695_v58 = vld [vmem:[%s2025_s1 + $0x18] sm:$0xff] (!%p1070_p10)  ;;  %s799_s1 = scalar_lea.vmem (!%p1070_p10), [#allocation16], %s2036_s20 }
 0x2ad   : > { %v801_v61 = vld [vmem:[%s799_s1 + $0x8] sm:$0xff] (!%p1070_p10)  ;;  %v803_v63 = vld [vmem:[%s799_s1 + $0x18] sm:$0xff] (!%p1070_p10)  ;;  %v800_v3 = vld [vmem:[%s799_s1] sm:$0xff] (!%p1070_p10) }
 0x2ae   : > { %v802_v5 = vld [vmem:[%s799_s1 + $0x10] sm:$0xff] (!%p1070_p10) }
 0x2b1   : > { %s1071_s18 = sadd.s32 (!%p1070_p10), 4294967295, %s2173_s13  ;;  %s670_s28 = ssub.s32 (!%p1070_p10), 0, %s2173_s13 }
 0x2b2   : > { %p656_p3 = scmp.lt.s32.totalorder (!%p1070_p10), %s1071_s18, 0  ;;  %s657_s27 = ssub.s32 (!%p1070_p10), 0, %s1071_s18 }
 0x2b3   : > { %s1072_s24 = smin.u32 %s1071_s18, %s657_s27  ;;  %s1076_s0 = smin.u32 %s2173_s13, %s670_s28 }
 0x2b4   : > { %s659_s17 = sand.u32 1, %s1072_s24   ;;  %s672_s11 = sand.u32 1, %s1076_s0  }
 0x2b5   : > { %s660_s16 = ssub.s32 0, %s659_s17  ;;  %p669_p0 = scmp.lt.s32.totalorder %s2173_s13, 0 }
 0x2b6   : > { %s2193_s16 = smov (!%p656_p3, %s660_s16), %s659_s17  ;;  %s673_s21 = ssub.s32 0, %s672_s11 }
 0x2b7   : > { %p1074_p13 = scmp.lt.s32.totalorder %s2193_s16, 0  ;;  %s666_s2 = sadd.s32 2, %s2193_s16 }
 0x2b8   : > { %s2197_s21 = smov (!%p669_p0, %s673_s21), %s672_s11  ;;  %s804_s23 = sld [smem:[#allocation15 + %s2173_s13]] }
 0x2b9   : > { %s2195_s2 = smov (!%p1074_p13, %s666_s2), %s2193_s16  ;;  %p1078_p2 = scmp.lt.s32.totalorder %s2197_s21, 0 }
 0x2ba   : > { %s1075_s9 = sshll.u32 %s2195_s2, 6  ;;  %s679_s10 = sadd.s32 2, %s2197_s21 }
 0x2bb   : > { %s683_s19 = scalar_lea.vmem [#allocation2], %s1075_s9  ;;  %s2199_s10 = smov (!%p1078_p2, %s679_s10), %s2197_s21 }
 0x2bc   : > { %v684_v45 = vld [vmem:[%s683_s19] sm:$0xff]  ;;  %v685_v46 = vld [vmem:[%s683_s19 + $0x8] sm:$0xff]  ;;  %v686_v47 = vld [vmem:[%s683_s19 + $0x10] sm:$0xff]  ;;  %s1079_s15 = sshll.u32 %s2199_s10, 6 }
 0x2bd   : > { %v1185_v48 = vpack.c.bf16 %v685_v46, %v684_v45  ;;  %v687_v49 = vld [vmem:[%s683_s19 + $0x18] sm:$0xff]  ;;  %v688_v51 = vld [vmem:[%s683_s19 + $0x20] sm:$0xff]  ;;  %v689_v52 = vld [vmem:[%s683_s19 + $0x28] sm:$0xff]  ;;  %s682_s7 = sadd.s32 %s1079_s15, %s2036_s20 }
 0x2be   : > { %v1189_v50 = vpack.c.bf16 %v687_v49, %v686_v47  ;;  %v1193_v53 = vpack.c.bf16 %v689_v52, %v688_v51  ;;  %v690_v54 = vld [vmem:[%s683_s19 + $0x30] sm:$0xff]  ;;  %v691_v55 = vld [vmem:[%s683_s19 + $0x38] sm:$0xff]  ;;  %v805_v59 = vstv %s804_s23  ;;  %s794_s18 = scalar_lea.vmem [#allocation2], %s682_s7 }
 0x2bf   : > { %1186 = vmatprep.subr.bf16.mxu0 %v1185_v48  ;;  %1201 = vmatprep.subr.bf16.mxu1 %v1185_v48  ;;  %v1197_v56 = vpack.c.bf16 %v691_v55, %v690_v54 }
 0x2c0   : > { %1188 = vmatpush3.bf16.msra.mxu0 %v1185_v48  ;;  %1205 = vmatpush3.bf16.msra.mxu1 %v1185_v48 }
 0x2c1   : > { %1190 = vmatprep.subr.bf16.mxu0 %v1189_v50  ;;  %1202 = vmatprep.subr.bf16.mxu1 %v1189_v50 }
 0x2c4   : > { %1192 = vmatpush3.bf16.msra.mxu0 %v1189_v50  ;;  %1206 = vmatpush3.bf16.msra.mxu1 %v1189_v50 }
 0x2c5   : > { %1194 = vmatprep.subr.bf16.mxu0 %v1193_v53  ;;  %1203 = vmatprep.subr.bf16.mxu1 %v1193_v53 }
 0x2c8   : > { %1196 = vmatpush3.bf16.msra.mxu0 %v1193_v53  ;;  %1207 = vmatpush3.bf16.msra.mxu1 %v1193_v53 }
 0x2c9   : > { %1198 = vmatprep.subr.bf16.mxu0 %v1197_v56  ;;  %1204 = vmatprep.subr.bf16.mxu1 %v1197_v56 }
 0x2cc   : > { %1200 = vmatpush3.bf16.msra.mxu0 %v1197_v56  ;;  %1208 = vmatpush3.bf16.msra.mxu1 %v1197_v56 }
 0x2cf   : > { %1164 = vmatmul.mubr.msk.f32.vlgmr.msra.gmra.mrb[0].mxu0 %vm696_vm1, %v693_v57  ;;  %1167 = vmatmul.mubr.msk.f32.vlgmr.msra.gmra.mrb[0].mxu1 %vm696_vm1, %v695_v58 }
 0x3a2   : > { %v1165_v60 = vpop.f32.mrb[0].mxu0  ;;  %v1168_v62 = vpop.f32.mrb[0].mxu1 }
 0x3a3   : > { %796 = vst [vmem:[%s794_s18 + $0x8] sm:$0xff] %v1165_v60  ;;  %v807_v0 = vmul.f32 %v1165_v60, %v805_v59  ;;  %798 = vst [vmem:[%s794_s18 + $0x18] sm:$0xff] %v1168_v62  ;;  %v809_v1 = vmul.f32 %v1168_v62, %v805_v59  ;;  %v775_v2 = vpop.f32.mrb[1].mxu0  ;;  %v785_v4 = vpop.f32.mrb[1].mxu1 }
 0x3a4   : > { %795 = vst [vmem:[%s794_s18] sm:$0xff] %v775_v2  ;;  %v806_v6 = vmul.f32 %v805_v59, %v775_v2  ;;  %797 = vst [vmem:[%s794_s18 + $0x10] sm:$0xff] %v785_v4  ;;  %v808_v7 = vmul.f32 %v805_v59, %v785_v4 }
 0x3a5   : > { %v811_v8 = vadd.f32 %v807_v0, %v801_v61  ;;  %v813_v9 = vadd.f32 %v809_v1, %v803_v63 }
 0x3a6   : > { %v810_v10 = vadd.f32 %v806_v6, %v800_v3  ;;  %v812_v11 = vadd.f32 %v808_v7, %v802_v5 }
 0x3a7   : > { %815 = vst [vmem:[%s799_s1 + $0x8] sm:$0xff] %v811_v8  ;;  %817 = vst [vmem:[%s799_s1 + $0x18] sm:$0xff] %v813_v9 }
 0x3a8   : > { %814 = vst [vmem:[%s799_s1] sm:$0xff] %v810_v10  ;;  %816 = vst [vmem:[%s799_s1 + $0x10] sm:$0xff] %v812_v11 }
 0x3a9 PF: > { %s2174_s13 = sld [smem:[#allocation24_spill]] }
 0x3af   : > { %p1084_p4 = scmp.ne.s32.totalorder %s2174_s13, 10 }
 0x3b0   : > { %v827_v12 = vlaneseq (!%p1084_p4)  ;;  %s2071_s27 = scalar_lea.vmem (!%p1084_p4), [#allocation16], %s2036_s20 }
 0x3b1   : > { %821 = sbr.rel (%p1084_p4) target bundleno = 1273 (0x4f9), region = 88  ;;  %v823_v13 = vld [vmem:[%s2071_s27] sm:$0xff] (!%p1084_p4)  ;;  %v825_v15 = vld [vmem:[%s2071_s27 + $0x10] sm:$0xff] (!%p1084_p4)  ;;  %v824_v16 = vld [vmem:[%s2071_s27 + $0x8] sm:$0xff] (!%p1084_p4) }
 0x3b2   : > { %v828_v14 = vand.u32 (!%p1084_p4), 127, %v827_v12  ;;  %v826_v17 = vld [vmem:[%s2071_s27 + $0x18] sm:$0xff] (!%p1084_p4) }
 0x3b4   : > { %vm829_vm2 = vcmp.lt.s32.totalorder (!%p1084_p4), %v828_v14, 8 }
 0x3b5   : > { %v830_v18 = vsel (!%p1084_p4), %vm829_vm2, %v823_v13, -inf  ;;  %v832_v19 = vsel (!%p1084_p4), %vm829_vm2, %v825_v15, -inf  ;;  %v831_v20 = vsel (!%p1084_p4), %vm829_vm2, %v824_v16, -inf  ;;  %v833_v21 = vsel (!%p1084_p4), %vm829_vm2, %v826_v17, -inf }
 0x3b6   : > { %834 = vmax.xlane.f32.xlu0 (!%p1084_p4), %v830_v18  ;;  %838 = vmax.xlane.f32.xlu1 (!%p1084_p4), %v832_v19 }
 0x3ba   : > { %836 = vmax.xlane.f32.xlu0 %v831_v20  ;;  %840 = vmax.xlane.f32.xlu1 %v833_v21 }
 0x443   : > { %v835_v22 = vpop.xlane.xlu0 %834  ;;  %v839_v23 = vpop.xlane.xlu1 %838 }
 0x444   : > { %v842_v24 = vsub.f32 %v830_v18, %v835_v22  ;;  %v844_v25 = vsub.f32 %v832_v19, %v839_v23 }
 0x446   : > { %v846_v26 = vmul.f32 1.442695, %v842_v24  ;;  %v850_v27 = vmul.f32 1.442695, %v844_v25 }
 0x447   : > { %v837_v28 = vpop.xlane.xlu0 %836  ;;  %v841_v29 = vpop.xlane.xlu1 %840 }
 0x448   : > { %1347 = vpow2.f32 %v846_v26  ;;  %v843_v30 = vsub.f32 %v831_v20, %v837_v28  ;;  %v845_v31 = vsub.f32 %v833_v21, %v841_v29 }
 0x449   : > { %1349 = vpow2.f32 %v850_v27 }
 0x44a   : > { %v848_v32 = vmul.f32 1.442695, %v843_v30  ;;  %v852_v33 = vmul.f32 1.442695, %v845_v31 }
 0x44c   : > { %1351 = vpow2.f32 %v848_v32 }
 0x44d   : > { %1353 = vpow2.f32 %v852_v33 }
 0x452   : > { %v1348_v34 = vpop.eup %1347 }
 0x453   : > { %854 = vadd.xlane.f32.xlu0 %v1348_v34  ;;  %v1350_v35 = vpop.eup %1349 }
 0x456   : > { %v1352_v36 = vpop.eup %1351 }
 0x457   : > { %858 = vadd.xlane.f32.xlu0 %v1350_v35  ;;  %856 = vadd.xlane.f32.xlu1 %v1352_v36  ;;  %v1354_v37 = vpop.eup %1353 }
 0x45b   : > { %860 = vadd.xlane.f32.xlu1 %v1354_v37 }
 0x4e0   : > { %v855_v38 = vpop.xlane.xlu0 %854 }
 0x4e1   : > { %1355 = vlog2.f32 %v855_v38 }
 0x4e4   : > { %v857_v39 = vpop.xlane.xlu1 %856  ;;  %v859_v40 = vpop.xlane.xlu0 %858 }
 0x4e5   : > { %1357 = vlog2.f32 %v857_v39 }
 0x4e6   : > { %1359 = vlog2.f32 %v859_v40 }
 0x4e8   : > { %v861_v41 = vpop.xlane.xlu1 %860 }
 0x4e9   : > { %1361 = vlog2.f32 %v861_v41 }
 0x4eb   : > { %v1356_v42 = vpop.eup %1355 }
 0x4ec   : > { %v863_v43 = vmul.f32 0.6931472, %v1356_v42 }
 0x4ee   : > { %v870_v44 = vsub.f32 %v842_v24, %v863_v43 }
 0x4ef   : > { %v1358_v45 = vpop.eup %1357 }
 0x4f0   : > { %v1360_v46 = vpop.eup %1359  ;;  %874 = vst [vmem:[%s2071_s27] sm:$0xff] %v870_v44  ;;  %v865_v47 = vmul.f32 0.6931472, %v1358_v45 }
 0x4f1   : > { %v867_v48 = vmul.f32 0.6931472, %v1360_v46 }
 0x4f2   : > { %v871_v49 = vsub.f32 %v843_v30, %v865_v47 }
 0x4f3   : > { %v1362_v50 = vpop.eup %1361  ;;  %v872_v51 = vsub.f32 %v844_v25, %v867_v48 }
 0x4f4   : > { %875 = vst [vmem:[%s2071_s27 + $0x8] sm:$0xff] %v871_v49  ;;  %v869_v52 = vmul.f32 0.6931472, %v1362_v50 }
 0x4f5   : > { %876 = vst [vmem:[%s2071_s27 + $0x10] sm:$0xff] %v872_v51 }
 0x4f6   : > { %v873_v53 = vsub.f32 %v845_v31, %v869_v52 }
 0x4f8   : > { %877 = vst [vmem:[%s2071_s27 + $0x18] sm:$0xff] %v873_v53 }
 0x4f9 PF: > { %s2175_s20 = sadd.s32 4294967295, %s1660_s8   ;;  %s1671_s17 = smov [#allocation16]  }
 0x4fa   : > { %p2083_p7 = scmp.eq.s32.totalorder %s2175_s20, 21  ;;  %s884_s16 = sshll.u32 %s1671_s17, 4  ;;  %s885_s16 = int_to_ptr.vmem [resolvable:$true] %s884_s16 }
 0x4fb   : > { %s1548_s2 = scalar_lea.vmem %s885_s16, 1024  ;;  %p1555_p11 = scmp.lt.s32.totalorder %s885_s16, %s885_s16 }
 0x4fc   : > { %p1549_p6 = scmp.ne.s32.totalorder %s885_s16, %s1548_s2  ;;  %p1556_p12 = scmp.lt.s32.totalorder %s1548_s2, %s1548_s2 }
 0x4fe   : > { %p1550_p5 = pnand %p1549_p6, %p2083_p7  ;;  %p1557_p8 = por %p1556_p12, %p1555_p11 }
 0x500   : > { %p1551_p9 = pneg %p1550_p5 }
 0x502   : > { %p1558_p1 = pnand %p1557_p8, %p1551_p9 }
 0x504   : > { %1561 = shalt.err (!%p1558_p1)
}
 0x505   : > { %s2177_s28 = sld [smem:[#allocation28_spill]] }
 0x50b   : > { %s2178_s0 = smov %s2177_s28  ;;  %s1562_s11 = scalar_lea.hbm %s2177_s28, 1024 }
 0x50c   : > { %p1563_p10 = scmp.ne.s32.totalorder %s2178_s0, %s1562_s11  ;;  %p1568_p0 = scmp.lt.u32.totalorder %s1562_s11, %s2178_s0 }
 0x50e   : > { %p1564_p3 = pnand %p1563_p10, %p2083_p7 }
 0x510   : > { %p1565_p13 = pneg %p1564_p3 }
 0x512   : > { %p1570_p2 = pnand %p1568_p0, %p1565_p13 }
 0x514   : > { %1573 = shalt.err (!%p1570_p2)
}
 0x515   : > { %s1672_s7 = smov 128   ;;  %s1673_s1 = smov 8  }
 0x516   : > { %1234 = dma.vmem_to_hbm [thread:$0]  (%p2083_p7), %s885_s16, 1024, %s2178_s0, [#allocation5], %s1672_s7, %s1672_s7, %s1673_s1  }
 0x517   : > { %1627 = dma.done.wait (%p2083_p7), [#allocation5], 1024  }
 0x518   : > { %1629 = vsyncadd (%p2083_p7), [#allocation5], 4294966272 }
 0x519 PF: > { %s27_s8 = sadd.s32 1, %s1660_s8   ;;  %s2179_s24 = smov %s1636_s25 }
 0x51a   : > { %p24_p4 = scmp.ge.s32.totalorder %s27_s8, 24   ;;  %s2180_s25 = smov %s1640_s26 }
 0x51b   : > { %s2181_s26 = smov %s1908_s22  ;;  %s2182_s27 = smov %s1652_s29 }
 0x51c   : > { %s2183_s28 = smov %s1656_s30  ;;  %s2184_s29 = smov %s2187_s12 }
 0x51d   : > { %s2185_s30 = smov %s2191_s14  ;;  %26 = sbr.rel (!%p24_p4) target bundleno = 16 (0x10), region = 137 }
 0x524   :  { %900 = vsyncpa [#allocation4], 1 }
 0x525   :  { %902 = vsyncpa [#allocation4 + $0x1], 1 }
 0x526   :  { %903 = vsyncpa [#allocation8], 1 }
 0x527   :  { %904 = vsyncpa [#allocation11], 1 }
 0x528   :  { %905 = vsyncpa [#allocation14], 1 }
 0x529   :  { %907 = vsyncpa [#allocation14 + $0x1], 1 }
 0x52a   :  { %908 = vsyncpa [#allocation5], 1 }
 0x52b   :  { %910 = vsyncpa [#allocation5 + $0x1], 1 }
 0x52c   :  { %911 = vsyncpa [#allocation6], 1 }
 0x52d   :  { %913 = vsyncpa [#allocation6 + $0x1], 1 }

</bundles_post_ra>
